<compile_context>
chip_gen: v5e
topology: v5e:2x2
jax: 0.10.0
libtpu: 0.0.40
codegen_flags: <defaults>
</compile_context>

<pallas_src>
import numpy as np
import jax
import jax.numpy as jnp
from jax.experimental import pallas as pl
from jax.experimental.pallas import tpu as pltpu

# ----------------------------------------------------------------------------
# net_config is not shipped with the module; choose small, forward-consistent
# values (x is (batch, 3), y is (batch, 1) -> in_features1=3, in_features2=4,
# out_features = z_dim + w_dim).
# ----------------------------------------------------------------------------
NET_CONFIG = {
    "in_features1": 3,
    "in_layer_num1": 2,
    "in_layers1": [32, 32],
    "in_features2": 4,           # cat([x, y], dim=1)
    "in_layer_num2": 2,
    "in_layers2": [32, 32],
    "z_dim": 8,
    "w_dim": 4,
    "out_features": 12,          # z_dim + w_dim
    "out_layer_num": 2,
    "out_layers": [32, 32],
}
ENC_Y_WIDTH = 1000  # hard-coded in CSVAE.__init__: encY = MLP(z_dim, 3, [1000,1000,1000])

IN1 = NET_CONFIG["in_features1"]
IN2 = NET_CONFIG["in_features2"]
ZD = NET_CONFIG["z_dim"]
WD = NET_CONFIG["w_dim"]
LANES = 128                     # lane-dense output slab width (one f32 vreg row)

# Column layout of the single (B, 128) output slab.
COL_Z = 0
COL_W = COL_Z + ZD              # 8
COL_MUZ = COL_W + WD            # 12
COL_SGZ = COL_MUZ + ZD          # 20
COL_MUW = COL_SGZ + ZD          # 28
COL_SGW = COL_MUW + WD          # 32
COL_REC = COL_SGW + WD          # 36
COL_PRD = COL_REC + IN1         # 39  (raw predY logit; sigmoid applied in wrapper)
COL_END = COL_PRD + 1           # 40

assert NET_CONFIG["out_features"] == ZD + WD
assert IN2 == IN1 + 1
assert COL_END <= LANES


# ----------------------------------------------------------------------------
# Pallas kernel: 2 matmuls + elementwise reparameterization + one lane-dense store.
# Purely affine; all outputs land directly at their final lane offsets.
# ----------------------------------------------------------------------------
def csvae_fwd_kernel(xin_ref, eps_ref, w1_ref, b1_ref, wh_ref, bh_ref, out_ref):
    xin = xin_ref[...]                                            # (TB, IN2) = [x | y]

    # Stage 1 (fused base|sigma): one (TB,IN2)@(IN2,256) matmul.
    #   cols [  0:128]: base slab  -> [0:8]=mu_z [8:12]=mu_w [12:20]=mu_z [20:28]=sigma_z
    #                                 [28:32]=mu_w [32:36]=sigma_w, rest 0
    #   cols [128:256]: sigma slab -> [0:8]=sigma_z [8:12]=sigma_w, rest 0
    s1 = jnp.dot(xin, w1_ref[...], preferred_element_type=jnp.float32) + b1_ref[...]
    base = s1[:, :LANES]                                          # vreg-boundary slice
    sig = s1[:, LANES:]

    # Reparameterization: eps holds eps_z|eps_w in cols [0:12] and zeros elsewhere,
    # so cols [0:12] become z|w while cols [12:36] pass through as mu/sigma stats.
    slab = base + sig * eps_ref[...]                              # (TB, 128)

    # Stage 2: collapsed decoder (rec) and encY+predY (logit).  wh has nonzero rows
    # only where slab holds z|w and nonzero columns only at [36:40], so the add
    # leaves cols [0:36] untouched and lands rec | logit at [36:40].
    slab = slab + jnp.dot(slab, wh_ref[...], preferred_element_type=jnp.float32) + bh_ref[...]

    out_ref[...] = slab                                           # single unmasked 128-lane store


# ----------------------------------------------------------------------------
# Parameter construction (deterministic, PyTorch-style Linear shapes).
# ----------------------------------------------------------------------------
def _linear_init(key, out_f, in_f):
    k_w, k_b = jax.random.split(key)
    bound = 1.0 / np.sqrt(in_f)
    w = jax.random.uniform(k_w, (out_f, in_f), jnp.float32, -bound, bound)   # (out, in)
    b = jax.random.uniform(k_b, (1, out_f), jnp.float32, -bound, bound)      # (1, out)
    return w, b


def init_params(key):
    cfg = NET_CONFIG
    ks = jax.random.split(key, 15)
    p = {}
    p["enc1.0"] = _linear_init(ks[0], cfg["in_layers1"][0], cfg["in_features1"])
    p["enc1.1"] = _linear_init(ks[1], cfg["in_layers1"][1], cfg["in_layers1"][0])
    p["enc2.0"] = _linear_init(ks[2], cfg["in_layers2"][0], cfg["in_features2"])
    p["enc2.1"] = _linear_init(ks[3], cfg["in_layers2"][1], cfg["in_layers2"][0])
    p["encMuZ"] = _linear_init(ks[4], cfg["z_dim"], cfg["in_layers1"][-1])
    p["encSigmaZ"] = _linear_init(ks[5], cfg["z_dim"], cfg["in_layers1"][-1])
    p["encMuW"] = _linear_init(ks[6], cfg["w_dim"], cfg["in_layers2"][-1])
    p["encSigmaW"] = _linear_init(ks[7], cfg["w_dim"], cfg["in_layers2"][-1])
    p["dec.0"] = _linear_init(ks[8], cfg["out_layers"][0], cfg["out_features"])
    p["dec.1"] = _linear_init(ks[9], cfg["out_layers"][1], cfg["out_layers"][0])
    p["decOut"] = _linear_init(ks[10], cfg["in_features1"], cfg["out_layers"][-1])
    p["encY.0"] = _linear_init(ks[11], ENC_Y_WIDTH, cfg["z_dim"])
    p["encY.1"] = _linear_init(ks[12], ENC_Y_WIDTH, ENC_Y_WIDTH)
    p["encY.2"] = _linear_init(ks[13], ENC_Y_WIDTH, ENC_Y_WIDTH)
    p["predY"] = _linear_init(ks[14], 1, ENC_Y_WIDTH)
    return p


# ----------------------------------------------------------------------------
# Wrapper-side weight packing (once per weight update): collapse the activation-free
# Linear chains and scatter the composed maps into lane-slab weight matrices.
# ----------------------------------------------------------------------------
def pack_weights(params):
    hp = jax.lax.Precision.HIGHEST

    def compose(names):
        # Compose x -> L1 -> ... -> Ln into A (in, out), c (1, out):  f(x) = x @ A + c.
        w0, b0 = params[names[0]]
        A, c = w0.T, b0
        for n in names[1:]:
            w, b = params[n]
            A = jnp.matmul(A, w.T, precision=hp)
            c = jnp.matmul(c, w.T, precision=hp) + b
        return A, c

    A_mz, c_mz = compose(["enc1.0", "enc1.1", "encMuZ"])            # (IN1, ZD)
    A_sz, c_sz = compose(["enc1.0", "enc1.1", "encSigmaZ"])         # (IN1, ZD)
    A_mw, c_mw = compose(["enc2.0", "enc2.1", "encMuW"])            # (IN2, WD)
    A_sw, c_sw = compose(["enc2.0", "enc2.1", "encSigmaW"])         # (IN2, WD)
    A_d, c_d = compose(["dec.0", "dec.1", "decOut"])                # (ZD+WD, IN1)
    A_y, c_y = compose(["encY.0", "encY.1", "encY.2", "predY"])     # (ZD, 1)

    # Fused stage-1 weight/bias: cols [0:128] = base slab, cols [128:256] = sigma slab.
    # Kernel input is xin = [x | y] (IN2 features); the enc1-composed maps see only x,
    # so their y row stays zero.
    w1 = jnp.zeros((IN2, 2 * LANES), jnp.float32)
    b1 = jnp.zeros((1, 2 * LANES), jnp.float32)
    # base half
    w1 = w1.at[:IN1, COL_Z:COL_Z + ZD].set(A_mz)          # z slot   <- mu_z
    w1 = w1.at[:, COL_W:COL_W + WD].set(A_mw)             # w slot   <- mu_w
    w1 = w1.at[:IN1, COL_MUZ:COL_MUZ + ZD].set(A_mz)
    w1 = w1.at[:IN1, COL_SGZ:COL_SGZ + ZD].set(A_sz)
    w1 = w1.at[:, COL_MUW:COL_MUW + WD].set(A_mw)
    w1 = w1.at[:, COL_SGW:COL_SGW + WD].set(A_sw)
    b1 = b1.at[:, COL_Z:COL_Z + ZD].set(c_mz)
    b1 = b1.at[:, COL_W:COL_W + WD].set(c_mw)
    b1 = b1.at[:, COL_MUZ:COL_MUZ + ZD].set(c_mz)
    b1 = b1.at[:, COL_SGZ:COL_SGZ + ZD].set(c_sz)
    b1 = b1.at[:, COL_MUW:COL_MUW + WD].set(c_mw)
    b1 = b1.at[:, COL_SGW:COL_SGW + WD].set(c_sw)
    # sigma half (only z|w slots nonzero; multiplied by eps in-kernel)
    w1 = w1.at[:IN1, LANES + COL_Z:LANES + COL_Z + ZD].set(A_sz)
    w1 = w1.at[:, LANES + COL_W:LANES + COL_W + WD].set(A_sw)
    b1 = b1.at[:, LANES + COL_Z:LANES + COL_Z + ZD].set(c_sz)
    b1 = b1.at[:, LANES + COL_W:LANES + COL_W + WD].set(c_sw)

    # Stage-2 head: rec = [z|w] @ A_d + c_d, logit = z @ A_y + c_y, placed at [36:40].
    w_head = jnp.zeros((LANES, LANES), jnp.float32)
    w_head = w_head.at[COL_Z:COL_Z + ZD + WD, COL_REC:COL_REC + IN1].set(A_d)
    w_head = w_head.at[COL_Z:COL_Z + ZD, COL_PRD:COL_PRD + 1].set(A_y)
    b_head = jnp.zeros((1, LANES), jnp.float32)
    b_head = b_head.at[:, COL_REC:COL_REC + IN1].set(c_d)
    b_head = b_head.at[:, COL_PRD:COL_PRD + 1].set(c_y)

    return {"w1": w1, "b1": b1, "w_head": w_head, "b_head": b_head}


# ----------------------------------------------------------------------------
# pallas_call with a batch grid (resident weights, batch-parallel semantics).
# ----------------------------------------------------------------------------
def _csvae_slab(packed, xin, eps_slab):
    B = xin.shape[0]
    # Small batches: one tile covering B.  Large batches: 256-aligned tile so the
    # (TB,128)@(128,128) head matmul fills the v6e/v7x MXU; double-buffered DMA
    # overlap and bounded VMEM come from the grid.
    TB = B if B <= 1024 else 1024
    grid = (pl.cdiv(B, TB),)
    return pl.pallas_call(
        csvae_fwd_kernel,
        out_shape=jax.ShapeDtypeStruct((B, LANES), jnp.float32),
        grid=grid,
        in_specs=[
            pl.BlockSpec((TB, IN2), lambda i: (i, 0)),            # xin, batch-tiled
            pl.BlockSpec((TB, LANES), lambda i: (i, 0)),          # eps slab, batch-tiled
            pl.BlockSpec((IN2, 2 * LANES), lambda i: (0, 0)),     # resident weights
            pl.BlockSpec((1, 2 * LANES), lambda i: (0, 0)),
            pl.BlockSpec((LANES, LANES), lambda i: (0, 0)),
            pl.BlockSpec((1, LANES), lambda i: (0, 0)),
        ],
        out_specs=pl.BlockSpec((TB, LANES), lambda i: (i, 0)),
        compiler_params=pltpu.CompilerParams(
            dimension_semantics=("parallel",)),                   # shards batch across v7x's 2 TCs
    )(xin, eps_slab, packed["w1"], packed["b1"], packed["w_head"], packed["b_head"])


# ----------------------------------------------------------------------------
# Jitted core: input packing, pallas_call, slab slicing, pred_y sigmoid — one dispatch.
# ----------------------------------------------------------------------------
@jax.jit
def _csvae_core(packed, x, y, eps_z, eps_w):
    B = x.shape[0]
    xin = jnp.concatenate([x, y], axis=1).astype(jnp.float32)                     # (B, IN2)
    eps_slab = jnp.concatenate(
        [eps_z.astype(jnp.float32), eps_w.astype(jnp.float32),
         jnp.zeros((B, LANES - ZD - WD), jnp.float32)], axis=1)                   # (B, 128), one op

    slab = _csvae_slab(packed, xin, eps_slab)

    z = slab[:, COL_Z:COL_Z + ZD]
    w = slab[:, COL_W:COL_W + WD]
    mu_z = slab[:, COL_MUZ:COL_MUZ + ZD]
    sigma_z = slab[:, COL_SGZ:COL_SGZ + ZD]
    mu_w = slab[:, COL_MUW:COL_MUW + WD]
    sigma_w = slab[:, COL_SGW:COL_SGW + WD]
    rec = slab[:, COL_REC:COL_REC + IN1]
    logit = slab[:, COL_PRD:COL_PRD + 1]
    # sigmoid(x) = 0.5*(tanh(0.5*x)+1): single EUP op on the 1-wide slice, fuses under jit.
    pred_y = 0.5 * (jnp.tanh(0.5 * logit) + 1.0)
    return z, w, mu_z, mu_w, sigma_z, sigma_w, rec, pred_y


# ----------------------------------------------------------------------------
# Forward wrapper.  Train mode takes host-resident y==k row indices from the caller
# (the data loader already owns y on host), so there is no device->host sync on the
# hot path; the gather is a device-side jnp.take on mu_w / sigma_w (valid since
# encMuW/encSigmaW are row-wise linear maps: encMuW(x2[y==k]) == encMuW(x2)[y==k]).
# ----------------------------------------------------------------------------
def csvae_forward(packed, x, y, eps_z, eps_w, mode="train", y_idx_0=None, y_idx_1=None):
    z, w, mu_z, mu_w, sigma_z, sigma_w, rec, pred_y = _csvae_core(packed, x, y, eps_z, eps_w)
    if mode != "train":
        return (z, w, mu_z, mu_w, sigma_z, sigma_w, rec, pred_y)

    if y_idx_0 is None or y_idx_1 is None:
        # TODO(synk): the dynamic-shape boolean row gather x2[y==k].view(-1,h) has no
        # fixed-shape jit/Pallas equivalent; fall back to a one-off host readback of y.
        y_host = np.asarray(jax.device_get(y))[:, 0]
        y_idx_0 = np.flatnonzero(y_host == 0)
        y_idx_1 = np.flatnonzero(y_host == 1)

    i0 = jnp.asarray(y_idx_0, dtype=jnp.int32)
    i1 = jnp.asarray(y_idx_1, dtype=jnp.int32)
    mu_w_0 = jnp.take(mu_w, i0, axis=0)
    mu_w_1 = jnp.take(mu_w, i1, axis=0)
    sigma_w_0 = jnp.take(sigma_w, i0, axis=0)
    sigma_w_1 = jnp.take(sigma_w, i1, axis=0)
    return (z, w, mu_z, mu_w_0, mu_w_1, sigma_z, sigma_w_0, sigma_w_1, rec, pred_y)


# ----------------------------------------------------------------------------
# Pure-JAX layer-by-layer reference (matches the PyTorch forward) for validation.
# ----------------------------------------------------------------------------
def reference_forward(params, x, y, eps_z, eps_w):
    hp = jax.lax.Precision.HIGHEST

    def lin(h, name):
        w, b = params[name]
        return jnp.matmul(h, w.T, precision=hp) + b

    xy = jnp.concatenate([x, y], axis=1)
    x1 = lin(lin(x, "enc1.0"), "enc1.1")
    x2 = lin(lin(xy, "enc2.0"), "enc2.1")
    mu_z = lin(x1, "encMuZ")
    sigma_z = lin(x1, "encSigmaZ")
    mu_w = lin(x2, "encMuW")
    sigma_w = lin(x2, "encSigmaW")
    z = mu_z + sigma_z * eps_z
    w = mu_w + sigma_w * eps_w
    zw = jnp.concatenate([z, w], axis=1)
    rec = lin(lin(lin(zw, "dec.0"), "dec.1"), "decOut")
    hy = lin(lin(lin(z, "encY.0"), "encY.1"), "encY.2")
    pred = 1.0 / (1.0 + jnp.exp(-lin(hy, "predY")))
    return (z, w, mu_z, mu_w, sigma_z, sigma_w, rec, pred)


# ----------------------------------------------------------------------------
# main
# ----------------------------------------------------------------------------
if __name__ == "__main__":
    key = jax.random.PRNGKey(0)
    k_param, k_x, k_ez, k_ew = jax.random.split(key, 4)

    B = 8
    params = init_params(k_param)
    packed = pack_weights(params)     # once per weight update (collapses the Linear chains)

    x = jax.random.uniform(k_x, (B, IN1), jnp.float32)                     # (8, 3)
    y_host = np.array([[0.0], [1.0], [0.0], [1.0], [1.0], [0.0], [0.0], [1.0]], np.float32)
    y = jnp.asarray(y_host)                                                # (8, 1)
    eps_z = jax.random.normal(k_ez, (B, ZD), jnp.float32)                  # re_parm noise
    eps_w = jax.random.normal(k_ew, (B, WD), jnp.float32)

    # Eval-mode call: full-batch outputs, compared against the layer-by-layer reference.
    outs_eval = jax.block_until_ready(csvae_forward(packed, x, y, eps_z, eps_w, mode="eval"))
    ref = reference_forward(params, x, y, eps_z, eps_w)
    for got, want in zip(outs_eval, ref):
        assert got.shape == want.shape, (got.shape, want.shape)
        assert bool(jnp.allclose(got, want, atol=1e-2, rtol=1e-2)), \
            float(jnp.max(jnp.abs(got - want)))

    # Train-mode call: y==k row indices come from the host copy of y the caller owns.
    idx0 = np.flatnonzero(y_host[:, 0] == 0)
    idx1 = np.flatnonzero(y_host[:, 0] == 1)
    outs_train = jax.block_until_ready(
        csvae_forward(packed, x, y, eps_z, eps_w, mode="train", y_idx_0=idx0, y_idx_1=idx1))
    (z, w, mu_z, mu_w_0, mu_w_1, sigma_z, sigma_w_0, sigma_w_1, rec, pred_y) = outs_train
    assert z.shape == (B, ZD) and w.shape == (B, WD)
    assert rec.shape == (B, IN1) and pred_y.shape == (B, 1)
    assert mu_w_0.shape == (len(idx0), WD) and mu_w_1.shape == (len(idx1), WD)
    assert sigma_w_0.shape == mu_w_0.shape and sigma_w_1.shape == mu_w_1.shape
    assert bool(jnp.all(jnp.isfinite(rec)))
    assert bool(jnp.all((pred_y >= 0.0) & (pred_y <= 1.0)))

    print("KERNEL_OK")
</pallas_src>

<mosaic_0001>
module attributes {stable_mosaic.version = 11 : i64} {
  func.func @csvae_fwd_kernel(%arg0: i32, %arg1: memref<8x4xf32, #tpu.memory_space<vmem>>, %arg2: memref<8x128xf32, #tpu.memory_space<vmem>>, %arg3: memref<4x256xf32, #tpu.memory_space<vmem>>, %arg4: memref<1x256xf32, #tpu.memory_space<vmem>>, %arg5: memref<128x128xf32, #tpu.memory_space<vmem>>, %arg6: memref<1x128xf32, #tpu.memory_space<vmem>>, %arg7: memref<8x128xf32, #tpu.memory_space<vmem>>) attributes {dimension_semantics = [#tpu.dimension_semantics<parallel>], iteration_bounds = array<i64: 1>, scalar_prefetch = 0 : i64, scratch_operands = 0 : i64, tpu.core_type = #tpu.core_type<tc>, window_params = [{transform_indices = @transform_0, window_bounds = array<i64: 8, 4>}, {transform_indices = @transform_1, window_bounds = array<i64: 8, 128>}, {pipeline_mode = #tpu.pipeline_mode<synchronous>, transform_indices = @transform_2, window_bounds = array<i64: 4, 256>}, {pipeline_mode = #tpu.pipeline_mode<synchronous>, transform_indices = @transform_3, window_bounds = array<i64: 1, 256>}, {pipeline_mode = #tpu.pipeline_mode<synchronous>, transform_indices = @transform_4, window_bounds = array<i64: 128, 128>}, {pipeline_mode = #tpu.pipeline_mode<synchronous>, transform_indices = @transform_5, window_bounds = array<i64: 1, 128>}, {transform_indices = @transform_6, window_bounds = array<i64: 8, 128>}]} {
    %c0 = arith.constant 0 : index
    %c0_0 = arith.constant 0 : index
    %0 = vector.load %arg1[%c0, %c0_0] : memref<8x4xf32, #tpu.memory_space<vmem>>, vector<8x4xf32>
    %c0_1 = arith.constant 0 : index
    %c0_2 = arith.constant 0 : index
    %1 = vector.load %arg3[%c0_1, %c0_2] : memref<4x256xf32, #tpu.memory_space<vmem>>, vector<4x256xf32>
    %cst = arith.constant dense<0.000000e+00> : vector<8x256xf32>
    %2 = tpu.matmul %0, %1, %cst {dimension_numbers = #tpu.dot_dimension_numbers<[1], [0], [0], [1], [0, 0, 1, 1], [], []>} : vector<8x4xf32>, vector<4x256xf32>, vector<8x256xf32> -> vector<8x256xf32>
    %c0_3 = arith.constant 0 : index
    %c0_4 = arith.constant 0 : index
    %3 = vector.load %arg4[%c0_3, %c0_4] : memref<1x256xf32, #tpu.memory_space<vmem>>, vector<1x256xf32>
    %4 = vector.broadcast %3 : vector<1x256xf32> to vector<8x256xf32>
    %5 = arith.addf %2, %4 : vector<8x256xf32>
    %6 = vector.extract_strided_slice %5 {offsets = [0, 0], sizes = [8, 128], strides = [1, 1]} : vector<8x256xf32> to vector<8x128xf32>
    %7 = vector.extract_strided_slice %5 {offsets = [0, 128], sizes = [8, 128], strides = [1, 1]} : vector<8x256xf32> to vector<8x128xf32>
    %c0_5 = arith.constant 0 : index
    %c0_6 = arith.constant 0 : index
    %8 = vector.load %arg2[%c0_5, %c0_6] : memref<8x128xf32, #tpu.memory_space<vmem>>, vector<8x128xf32>
    %9 = arith.mulf %7, %8 : vector<8x128xf32>
    %10 = arith.addf %6, %9 : vector<8x128xf32>
    %c0_7 = arith.constant 0 : index
    %c0_8 = arith.constant 0 : index
    %11 = vector.load %arg5[%c0_7, %c0_8] : memref<128x128xf32, #tpu.memory_space<vmem>>, vector<128x128xf32>
    %cst_9 = arith.constant dense<0.000000e+00> : vector<8x128xf32>
    %12 = tpu.matmul %10, %11, %cst_9 {dimension_numbers = #tpu.dot_dimension_numbers<[1], [0], [0], [1], [0, 0, 1, 1], [], []>} : vector<8x128xf32>, vector<128x128xf32>, vector<8x128xf32> -> vector<8x128xf32>
    %13 = arith.addf %10, %12 : vector<8x128xf32>
    %c0_10 = arith.constant 0 : index
    %c0_11 = arith.constant 0 : index
    %14 = vector.load %arg6[%c0_10, %c0_11] : memref<1x128xf32, #tpu.memory_space<vmem>>, vector<1x128xf32>
    %15 = vector.broadcast %14 : vector<1x128xf32> to vector<8x128xf32>
    %16 = arith.addf %13, %15 : vector<8x128xf32>
    %c0_12 = arith.constant 0 : index
    %c0_13 = arith.constant 0 : index
    %17 = vector.load %arg7[%c0_12, %c0_13] : memref<8x128xf32, #tpu.memory_space<vmem>>, vector<8x128xf32>
    tpu.vector_store %arg7[%c0_12, %c0_13], %16 {strides = array<i32>} : memref<8x128xf32, #tpu.memory_space<vmem>>, vector<8x128xf32>,
    return
  }
  func.func @transform_0(%arg0: i32) -> (i32, i32) {
    %c0_i32 = arith.constant 0 : i32
    %c0_i32_0 = arith.constant 0 : i32
    return %arg0, %c0_i32 : i32, i32
  }
  func.func @transform_1(%arg0: i32) -> (i32, i32) {
    %c0_i32 = arith.constant 0 : i32
    %c0_i32_0 = arith.constant 0 : i32
    return %arg0, %c0_i32 : i32, i32
  }
  func.func @transform_2(%arg0: i32) -> (i32, i32) {
    %c0_i32 = arith.constant 0 : i32
    %c0_i32_0 = arith.constant 0 : i32
    %c0_i32_1 = arith.constant 0 : i32
    return %c0_i32, %c0_i32_0 : i32, i32
  }
  func.func @transform_3(%arg0: i32) -> (i32, i32) {
    %c0_i32 = arith.constant 0 : i32
    %c0_i32_0 = arith.constant 0 : i32
    %c0_i32_1 = arith.constant 0 : i32
    return %c0_i32, %c0_i32_0 : i32, i32
  }
  func.func @transform_4(%arg0: i32) -> (i32, i32) {
    %c0_i32 = arith.constant 0 : i32
    %c0_i32_0 = arith.constant 0 : i32
    %c0_i32_1 = arith.constant 0 : i32
    return %c0_i32, %c0_i32_0 : i32, i32
  }
  func.func @transform_5(%arg0: i32) -> (i32, i32) {
    %c0_i32 = arith.constant 0 : i32
    %c0_i32_0 = arith.constant 0 : i32
    %c0_i32_1 = arith.constant 0 : i32
    return %c0_i32, %c0_i32_0 : i32, i32
  }
  func.func @transform_6(%arg0: i32) -> (i32, i32) {
    %c0_i32 = arith.constant 0 : i32
    %c0_i32_0 = arith.constant 0 : i32
    return %arg0, %c0_i32 : i32, i32
  }
}

</mosaic_0001>

<bundles_post_ra>
// kernel: _csvae_core.1
= control target key start
LH: loop header
LB: loop body
LE: loop exit
PB: predicated region body
PF: predicated region fallthrough
CT: control target
= control target key end

     0   :  { %11 = vsyncpa [#allocation3], 0  ;;  %s185_s24 = smov [#allocation2]   ;;  %s186_s26 = smov 128   ;;  %s244_s0 = inlined_call_operand.vmem [shape: f32[8,4], index: 0, kind: input, shape index: {}]   ;;  %s245_s1 = inlined_call_operand.vmem [shape: f32[8,128], index: 1, kind: input, shape index: {}]   ;;  %s246_s2 = inlined_call_operand.vmem [shape: f32[4,256], index: 2, kind: input, shape index: {}]   ;;  %s247_s3 = inlined_call_operand.vmem [shape: f32[1,256], index: 3, kind: input, shape index: {}]   ;;  %s248_s4 = inlined_call_operand.hbm [shape: f32[128,128], index: 4, kind: input, shape index: {}]   ;;  %s249_s5 = inlined_call_operand.vmem [shape: f32[1,128], index: 5, kind: input, shape index: {}]   ;;  %s250_s6 = inlined_call_operand.vmem [shape: f32[8,128], index: 6, kind: output, shape index: {}]  }
   0x1   :  { %s24_s23 = sshll.u32 %s248_s4, 4  ;;  %s26_s25 = sshll.u32 %s185_s24, 4  ;;  %s25_s23 = int_to_ptr.hbm [resolvable:$true] %s24_s23  ;;  %s27_s25 = int_to_ptr.vmem [resolvable:$true] %s26_s25 }
   0x2   :  { %s187_s27 = smov 8  }
   0x3   :  { %32 = dma.hbm_to_vmem [thread:$0]  %s25_s23, 2048, %s27_s25, [#allocation3], %s186_s26, %s186_s26, %s187_s27  }
   0x4   :  { %183 = dma.done.wait [#allocation3], 2048  }
   0x5   :  { %184 = vsyncadd [#allocation3], 4294965248  ;;  %v40_v0 = vld [vmem:[%s246_s2] sm:$0xff]  ;;  %v117_v2 = vld [vmem:[#allocation2 + $0x70] sm:$0xff]  ;;  %vm55_vm0 = vcmask 1043456   ;;  %vm51_vm1 = vcmask 31744  }
   0x6   :  { %v118_v1 = vld [vmem:[#allocation2 + $0x78] sm:$0xff]  ;;  %48 = vst [vmem:[#allocation1] ss:$2 sm:$0xff] %v40_v0  ;;  %v116_v3 = vld [vmem:[#allocation2 + $0x68] sm:$0xff]  ;;  %v115_v4 = vld [vmem:[#allocation2 + $0x60] sm:$0xff] }
   0x7   :  { %119 = vmatpush.msra.mxu2 %v118_v1  ;;  %v39_v5 = vld [vmem:[%s244_s0] sm:$0xff]  ;;  %v113_v9 = vld [vmem:[#allocation2 + $0x50] sm:$0xff]  ;;  %v112_v10 = vld [vmem:[#allocation2 + $0x48] sm:$0xff] }
   0x8   :  { %v114_v6 = vld [vmem:[#allocation2 + $0x58] sm:$0xff]  ;;  %v111_v11 = vld [vmem:[#allocation2 + $0x40] sm:$0xff]  ;;  %v109_v13 = vld [vmem:[#allocation2 + $0x30] sm:$0xff] }
   0x9   :  { %120 = vmatpush.msra.mxu2 %v117_v2  ;;  %v110_v12 = vld [vmem:[#allocation2 + $0x38] sm:$0xff]  ;;  %v108_v14 = vld [vmem:[#allocation2 + $0x28] sm:$0xff]  ;;  %v107_v15 = vld [vmem:[#allocation2 + $0x20] sm:$0xff] }
   0xa   :  { %v106_v16 = vld [vmem:[#allocation2 + $0x18] sm:$0xff]  ;;  %v105_v17 = vld [vmem:[#allocation2 + $0x10] sm:$0xff]  ;;  %v104_v18 = vld [vmem:[#allocation2 + $0x8] sm:$0xff] }
   0xb   :  { %121 = vmatpush.msra.mxu2 %v116_v3  ;;  %v103_v19 = vld [vmem:[#allocation2] sm:$0xff]  ;;  %v41_v20 = vld [vmem:[%s247_s3] sm:$0x3] }
   0xc   :  { %v44_v21 = vperm.slane %v41_v20, 1  ;;  %v43_v22 = vperm.slane %v41_v20, 0  ;;  %v100_v24 = vld [vmem:[%s245_s1] sm:$0xff] }
   0xd   :  { %122 = vmatpush.msra.mxu2 %v115_v4  ;;  %v50_v7 = vld.sshfl [vmem:[#allocation1 + $0x8] sm:$0xff pattern:$0x75316420]  ;;  %v49_v8 = vld.sshfl [vmem:[#allocation1] sm:$0xff pattern:$0x75316420] }
   0xe   :  { %153 = vmatpush.msk.msra.mxu1 %vm55_vm0, %v50_v7  ;;  %151 = vmatpush.msk.msra.mxu0 %vm55_vm0, %v49_v8  ;;  %v158_v30 = vld [vmem:[%s249_s5] ss:$0 sm:$0xff] }
   0xf   :  { %154 = vmatmul.msk.f32.vlgmr.msra.gmra.mxu1 %vm51_vm1, %v39_v5  ;;  %152 = vmatmul.msk.f32.vlgmr.msra.gmra.mxu0 %vm51_vm1, %v39_v5 }
  0x10   :  { %123 = vmatpush.msra.mxu2 %v114_v6 }
  0x12   :  { %124 = vmatpush.msra.mxu2 %v113_v9 }
  0x14   :  { %125 = vmatpush.msra.mxu2 %v112_v10 }
  0x16   :  { %126 = vmatpush.msra.mxu2 %v111_v11 }
  0x18   :  { %127 = vmatpush.msra.mxu2 %v110_v12 }
  0x1a   :  { %128 = vmatpush.msra.mxu2 %v109_v13 }
  0x1c   :  { %129 = vmatpush.msra.mxu2 %v108_v14 }
  0x1e   :  { %130 = vmatpush.msra.mxu2 %v107_v15 }
  0x20   :  { %131 = vmatpush.msra.mxu2 %v106_v16 }
  0x22   :  { %132 = vmatpush.msra.mxu2 %v105_v17 }
  0x24   :  { %133 = vmatpush.msra.mxu2 %v104_v18 }
  0x26   :  { %134 = vmatpush.msra.mxu2 %v103_v19 }
  0x8c   :  { %v97_v23 = vpop.f32.mrf.mxu1  ;;  %v77_v25 = vpop.f32.mrf.mxu0 }
  0x8d   :  { %v98_v26 = vadd.f32 %v97_v23, %v44_v21  ;;  %v78_v27 = vadd.f32 %v77_v25, %v43_v22 }
  0x8f   :  { %v101_v28 = vmul.f32 %v100_v24, %v98_v26 }
  0x91   :  { %v102_v29 = vadd.f32 %v101_v28, %v78_v27 }
  0x93   :  { %135 = vmatmul.f32.vlgmr.msra.gmra.mxu2 %v102_v29 }
 0x116   :  { %v136_v31 = vpop.f32.mrf.mxu2 }
 0x117   :  { %v139_v32 = vadd.f32 %v136_v31, %v102_v29 }
 0x119   :  { %v144_v33 = vadd.f32 %v158_v30, %v139_v32 }
 0x11b   :  { %145 = vst [vmem:[%s250_s6] sm:$0xff] %v144_v33 }
 0x11c   :  { %150 = vsyncpa [#allocation3], 1 }

</bundles_post_ra>
